<compile_context>
chip_gen: v7x
topology: tpu7x:2x2x1
jax: 0.10.0
libtpu: 0.0.40
codegen_flags: <defaults>
</compile_context>

<pallas_src>
import functools

import jax
import jax.numpy as jnp
from jax.experimental import pallas as pl
from jax.experimental.pallas import tpu as pltpu

D_IN, H, D_OUT = 784, 200, 10
H_PAD, D_OUT_PAD = 256, 128  # 128/256-aligned padded dims (full MXU tiles)


def _round_up(n, m):
    return ((n + m - 1) // m) * m


def mlp_kernel(x_ref, w1_ref, b1_ref, w2_ref, b2_ref, w3_ref, b3_ref, o_ref):
    # In-kernel cast of x to the weights' compute dtype (bf16 by default):
    # a VPU op that hides under MXU work, avoiding a separate HBM cast pass.
    x = x_ref[...].astype(w1_ref.dtype)
    # fc1 + ReLU  (MXU matmul, f32 accumulate; bias/ReLU on the f32 accumulator)
    h1 = jnp.dot(x, w1_ref[...], preferred_element_type=jnp.float32)
    h1 = jnp.maximum(h1 + b1_ref[...], 0.0)
    # fc2 + ReLU
    h2 = jnp.dot(h1.astype(w2_ref.dtype), w2_ref[...],
                 preferred_element_type=jnp.float32)
    h2 = jnp.maximum(h2 + b2_ref[...], 0.0)
    # fc3 (no activation); padded output cols are exact zeros (zero W/b padding)
    h3 = jnp.dot(h2.astype(w3_ref.dtype), w3_ref[...],
                 preferred_element_type=jnp.float32)
    o_ref[...] = (h3 + b3_ref[...]).astype(o_ref.dtype)


def prepare_params(params, *, compute_dtype=jnp.bfloat16):
    """Pad hidden 200->256 and output 10->128 and cast weights ONCE at init.

    `params` holds weights transposed vs PyTorch ([in, out]) and (1, out) biases,
    so every layer is y = x @ W + b (== nn.Linear's x @ W.T + b). Biases stay
    f32 (added to the f32 accumulator). Zero padding keeps padded output
    columns exactly zero.
    """
    w1 = jnp.pad(params["w1"], ((0, 0), (0, H_PAD - H))).astype(compute_dtype)
    b1 = jnp.pad(params["b1"], ((0, 0), (0, H_PAD - H))).astype(jnp.float32)
    w2 = jnp.pad(params["w2"], ((0, H_PAD - H), (0, H_PAD - H))).astype(compute_dtype)
    b2 = jnp.pad(params["b2"], ((0, 0), (0, H_PAD - H))).astype(jnp.float32)
    w3 = jnp.pad(params["w3"], ((0, H_PAD - H), (0, D_OUT_PAD - D_OUT))).astype(compute_dtype)
    b3 = jnp.pad(params["b3"], ((0, 0), (0, D_OUT_PAD - D_OUT))).astype(jnp.float32)
    return (w1, b1, w2, b2, w3, b3)


def _pick_batch_tile(B, max_tile):
    """Batch tile: single step for small B; otherwise >= 4 (even) grid steps so
    v7x's two TensorCores each get >= 2 pipelined iterations."""
    B8 = _round_up(max(B, 8), 8)
    if B8 <= max_tile:
        return B8
    steps = 4
    while _round_up(pl.cdiv(B8, steps), 8) > max_tile:
        steps += 2
    return _round_up(pl.cdiv(B8, steps), 8)


def mnist_2nn_forward(x, padded_params, *, batch_tile=512, return_padded=False,
                      out_dtype=jnp.float32, vmem_limit_bytes=32 * 1024 * 1024):
    """Forward pass of Mnist_2NN.

    x: [B, 784] float32 (kept f32 in HBM; cast to bf16 inside the kernel).
    padded_params: tuple from prepare_params() (padded + bf16-cast weights).
    return_padded: if True, return the raw (B_pad, 128) kernel output and let
      the consumer slice/fuse it (avoids the extra [:B, :10] copy pass).
    Per-chip tuning: batch_tile=512 is safe everywhere; v6e can use 1024-2048
    (128 MiB VMEM), keep <= ~1024 and vmem_limit_bytes <= ~40 MiB on v7x (64 MiB).
    """
    B, d_in = x.shape
    assert d_in == D_IN
    w1, b1, w2, b2, w3, b3 = padded_params

    bt = _pick_batch_tile(B, batch_tile)
    B_pad = _round_up(B, bt)
    grid = (B_pad // bt,)

    x_p = x if B_pad == B else jnp.pad(x, ((0, B_pad - B), (0, 0)))

    def const_spec(shape):  # weights/biases: same block for every grid step
        return pl.BlockSpec(shape, lambda i: tuple(0 for _ in shape))

    out = pl.pallas_call(
        mlp_kernel,
        out_shape=jax.ShapeDtypeStruct((B_pad, D_OUT_PAD), out_dtype),
        grid_spec=pltpu.PrefetchScalarGridSpec(
            num_scalar_prefetch=0,
            grid=grid,
            in_specs=[
                pl.BlockSpec((bt, D_IN), lambda i: (i, 0)),   # x tile (f32)
                const_spec((D_IN, H_PAD)),                    # W1^T (bf16, padded)
                const_spec((1, H_PAD)),                       # b1 (f32)
                const_spec((H_PAD, H_PAD)),                   # W2^T
                const_spec((1, H_PAD)),                       # b2
                const_spec((H_PAD, D_OUT_PAD)),               # W3^T
                const_spec((1, D_OUT_PAD)),                   # b3
            ],
            out_specs=pl.BlockSpec((bt, D_OUT_PAD), lambda i: (i, 0)),
        ),
        compiler_params=pltpu.CompilerParams(
            dimension_semantics=("parallel",),
            vmem_limit_bytes=vmem_limit_bytes,
        ),
    )(x_p, w1, b1, w2, b2, w3, b3)

    if return_padded:
        return out  # rows >= B and cols >= 10 are padding
    return out[:B, :D_OUT]


def init_params(key):
    """Deterministic synthetic params matching nn.Linear init, stored transposed
    ([in, out]); biases kept 2-D [1, out] for TPU layout."""
    k1, k2, k3, k4, k5, k6 = jax.random.split(key, 6)

    def uinit(k, shape, fan_in):
        bound = 1.0 / jnp.sqrt(fan_in)
        return jax.random.uniform(k, shape, jnp.float32, -bound, bound)

    return {
        "w1": uinit(k1, (D_IN, H), D_IN),
        "b1": uinit(k2, (1, H), D_IN),
        "w2": uinit(k3, (H, H), H),
        "b2": uinit(k4, (1, H), H),
        "w3": uinit(k5, (H, D_OUT), H),
        "b3": uinit(k6, (1, D_OUT), H),
    }


def reference_forward_f32(x, p):
    h1 = jnp.maximum(x @ p["w1"] + p["b1"], 0.0)
    h2 = jnp.maximum(h1 @ p["w2"] + p["b2"], 0.0)
    return h2 @ p["w3"] + p["b3"]


def reference_forward_bf16(x, p):
    """Mirrors the kernel's numerics: bf16 MXU inputs, f32 accumulation,
    f32 bias + ReLU."""
    bf = jnp.bfloat16

    def lin(a, w, b):
        return jnp.dot(a.astype(bf), w.astype(bf),
                       preferred_element_type=jnp.float32) + b

    h1 = jnp.maximum(lin(x, p["w1"], p["b1"]), 0.0)
    h2 = jnp.maximum(lin(h1, p["w2"], p["b2"]), 0.0)
    return lin(h2, p["w3"], p["b3"])


if __name__ == "__main__":
    key = jax.random.PRNGKey(0)
    pkey, xkey = jax.random.split(key)
    params = init_params(pkey)
    padded_params = prepare_params(params)  # pad + cast once, reuse per call

    fwd = jax.jit(functools.partial(mnist_2nn_forward, batch_tile=512))

    # Small batch: single grid step.
    B = 8
    x = jax.random.normal(xkey, (B, D_IN), jnp.float32)
    out = jax.block_until_ready(fwd(x, padded_params))
    assert out.shape == (B, D_OUT)
    ref_bf16 = reference_forward_bf16(x, params)
    ref_f32 = reference_forward_f32(x, params)
    assert jnp.allclose(out, ref_bf16, atol=2e-3, rtol=2e-3), \
        "mismatch vs bf16-faithful reference (small batch)"
    assert jnp.allclose(out, ref_f32, atol=6e-2, rtol=6e-2), \
        "mismatch vs f32 reference (small batch)"

    # Larger, non-multiple batch: exercises batch padding and a 4-step
    # "parallel" grid (pipelining everywhere, 2 steps per core on v7x).
    B2 = 1000
    x2 = jax.random.normal(xkey, (B2, D_IN), jnp.float32)
    out2 = jax.block_until_ready(fwd(x2, padded_params))
    assert out2.shape == (B2, D_OUT)
    ref2_bf16 = reference_forward_bf16(x2, params)
    ref2_f32 = reference_forward_f32(x2, params)
    assert jnp.allclose(out2, ref2_bf16, atol=2e-3, rtol=2e-3), \
        "mismatch vs bf16-faithful reference (tiled batch)"
    assert jnp.allclose(out2, ref2_f32, atol=6e-2, rtol=6e-2), \
        "mismatch vs f32 reference (tiled batch)"

    # Padded-output path: consumer-side slicing (no extra copy in the wrapper).
    out_pad = jax.block_until_ready(
        mnist_2nn_forward(x, padded_params, return_padded=True))
    assert out_pad.shape[1] == D_OUT_PAD
    assert jnp.allclose(out_pad[:B, :D_OUT], out, atol=1e-6, rtol=1e-6)

    print("KERNEL_OK")
</pallas_src>

<mosaic_0001>
module attributes {stable_mosaic.version = 11 : i64} {
  func.func @mlp_kernel(%arg0: i32, %arg1: memref<8x784xf32, #tpu.memory_space<vmem>>, %arg2: memref<784x256xbf16, #tpu.memory_space<vmem>>, %arg3: memref<1x256xf32, #tpu.memory_space<vmem>>, %arg4: memref<256x256xbf16, #tpu.memory_space<vmem>>, %arg5: memref<1x256xf32, #tpu.memory_space<vmem>>, %arg6: memref<256x128xbf16, #tpu.memory_space<vmem>>, %arg7: memref<1x128xf32, #tpu.memory_space<vmem>>, %arg8: memref<8x128xf32, #tpu.memory_space<vmem>>) attributes {dimension_semantics = [#tpu.dimension_semantics<parallel>], iteration_bounds = array<i64: 1>, scalar_prefetch = 0 : i64, scratch_operands = 0 : i64, tpu.core_type = #tpu.core_type<tc>, window_params = [{transform_indices = @transform_0, window_bounds = array<i64: 8, 784>}, {pipeline_mode = #tpu.pipeline_mode<synchronous>, transform_indices = @transform_1, window_bounds = array<i64: 784, 256>}, {pipeline_mode = #tpu.pipeline_mode<synchronous>, transform_indices = @transform_2, window_bounds = array<i64: 1, 256>}, {pipeline_mode = #tpu.pipeline_mode<synchronous>, transform_indices = @transform_3, window_bounds = array<i64: 256, 256>}, {pipeline_mode = #tpu.pipeline_mode<synchronous>, transform_indices = @transform_4, window_bounds = array<i64: 1, 256>}, {pipeline_mode = #tpu.pipeline_mode<synchronous>, transform_indices = @transform_5, window_bounds = array<i64: 256, 128>}, {pipeline_mode = #tpu.pipeline_mode<synchronous>, transform_indices = @transform_6, window_bounds = array<i64: 1, 128>}, {transform_indices = @transform_7, window_bounds = array<i64: 8, 128>}]} {
    %c0 = arith.constant 0 : index
    %c0_0 = arith.constant 0 : index
    %0 = vector.load %arg1[%c0, %c0_0] : memref<8x784xf32, #tpu.memory_space<vmem>>, vector<8x784xf32>
    %1 = arith.truncf %0 : vector<8x784xf32> to vector<8x784xbf16>
    %c0_1 = arith.constant 0 : index
    %c0_2 = arith.constant 0 : index
    %2 = vector.load %arg2[%c0_1, %c0_2] : memref<784x256xbf16, #tpu.memory_space<vmem>>, vector<784x256xbf16>
    %cst = arith.constant dense<0.000000e+00> : vector<8x256xf32>
    %3 = tpu.matmul %1, %2, %cst {dimension_numbers = #tpu.dot_dimension_numbers<[1], [0], [0], [1], [0, 0, 1, 1], [], []>} : vector<8x784xbf16>, vector<784x256xbf16>, vector<8x256xf32> -> vector<8x256xf32>
    %c0_3 = arith.constant 0 : index
    %c0_4 = arith.constant 0 : index
    %4 = vector.load %arg3[%c0_3, %c0_4] : memref<1x256xf32, #tpu.memory_space<vmem>>, vector<1x256xf32>
    %5 = vector.broadcast %4 : vector<1x256xf32> to vector<8x256xf32>
    %6 = arith.addf %3, %5 : vector<8x256xf32>
    %cst_5 = arith.constant 0.000000e+00 : f32
    %7 = vector.broadcast %cst_5 : f32 to vector<8x256xf32>
    %8 = arith.maximumf %6, %7 : vector<8x256xf32>
    %9 = arith.truncf %8 : vector<8x256xf32> to vector<8x256xbf16>
    %c0_6 = arith.constant 0 : index
    %c0_7 = arith.constant 0 : index
    %10 = vector.load %arg4[%c0_6, %c0_7] : memref<256x256xbf16, #tpu.memory_space<vmem>>, vector<256x256xbf16>
    %cst_8 = arith.constant dense<0.000000e+00> : vector<8x256xf32>
    %11 = tpu.matmul %9, %10, %cst_8 {dimension_numbers = #tpu.dot_dimension_numbers<[1], [0], [0], [1], [0, 0, 1, 1], [], []>} : vector<8x256xbf16>, vector<256x256xbf16>, vector<8x256xf32> -> vector<8x256xf32>
    %c0_9 = arith.constant 0 : index
    %c0_10 = arith.constant 0 : index
    %12 = vector.load %arg5[%c0_9, %c0_10] : memref<1x256xf32, #tpu.memory_space<vmem>>, vector<1x256xf32>
    %13 = vector.broadcast %12 : vector<1x256xf32> to vector<8x256xf32>
    %14 = arith.addf %11, %13 : vector<8x256xf32>
    %cst_11 = arith.constant 0.000000e+00 : f32
    %15 = vector.broadcast %cst_11 : f32 to vector<8x256xf32>
    %16 = arith.maximumf %14, %15 : vector<8x256xf32>
    %17 = arith.truncf %16 : vector<8x256xf32> to vector<8x256xbf16>
    %c0_12 = arith.constant 0 : index
    %c0_13 = arith.constant 0 : index
    %18 = vector.load %arg6[%c0_12, %c0_13] : memref<256x128xbf16, #tpu.memory_space<vmem>>, vector<256x128xbf16>
    %cst_14 = arith.constant dense<0.000000e+00> : vector<8x128xf32>
    %19 = tpu.matmul %17, %18, %cst_14 {dimension_numbers = #tpu.dot_dimension_numbers<[1], [0], [0], [1], [0, 0, 1, 1], [], []>} : vector<8x256xbf16>, vector<256x128xbf16>, vector<8x128xf32> -> vector<8x128xf32>
    %c0_15 = arith.constant 0 : index
    %c0_16 = arith.constant 0 : index
    %20 = vector.load %arg7[%c0_15, %c0_16] : memref<1x128xf32, #tpu.memory_space<vmem>>, vector<1x128xf32>
    %21 = vector.broadcast %20 : vector<1x128xf32> to vector<8x128xf32>
    %22 = arith.addf %19, %21 : vector<8x128xf32>
    %c0_17 = arith.constant 0 : index
    %c0_18 = arith.constant 0 : index
    %23 = vector.load %arg8[%c0_17, %c0_18] : memref<8x128xf32, #tpu.memory_space<vmem>>, vector<8x128xf32>
    tpu.vector_store %arg8[%c0_17, %c0_18], %22 {strides = array<i32>} : memref<8x128xf32, #tpu.memory_space<vmem>>, vector<8x128xf32>,
    return
  }
  func.func @transform_0(%arg0: i32) -> (i32, i32) {
    %c0_i32 = arith.constant 0 : i32
    %c0_i32_0 = arith.constant 0 : i32
    return %arg0, %c0_i32 : i32, i32
  }
  func.func @transform_1(%arg0: i32) -> (i32, i32) {
    %c0_i32 = arith.constant 0 : i32
    %c0_i32_0 = arith.constant 0 : i32
    %c0_i32_1 = arith.constant 0 : i32
    return %c0_i32, %c0_i32_0 : i32, i32
  }
  func.func @transform_2(%arg0: i32) -> (i32, i32) {
    %c0_i32 = arith.constant 0 : i32
    %c0_i32_0 = arith.constant 0 : i32
    %c0_i32_1 = arith.constant 0 : i32
    return %c0_i32, %c0_i32_0 : i32, i32
  }
  func.func @transform_3(%arg0: i32) -> (i32, i32) {
    %c0_i32 = arith.constant 0 : i32
    %c0_i32_0 = arith.constant 0 : i32
    %c0_i32_1 = arith.constant 0 : i32
    return %c0_i32, %c0_i32_0 : i32, i32
  }
  func.func @transform_4(%arg0: i32) -> (i32, i32) {
    %c0_i32 = arith.constant 0 : i32
    %c0_i32_0 = arith.constant 0 : i32
    %c0_i32_1 = arith.constant 0 : i32
    return %c0_i32, %c0_i32_0 : i32, i32
  }
  func.func @transform_5(%arg0: i32) -> (i32, i32) {
    %c0_i32 = arith.constant 0 : i32
    %c0_i32_0 = arith.constant 0 : i32
    %c0_i32_1 = arith.constant 0 : i32
    return %c0_i32, %c0_i32_0 : i32, i32
  }
  func.func @transform_6(%arg0: i32) -> (i32, i32) {
    %c0_i32 = arith.constant 0 : i32
    %c0_i32_0 = arith.constant 0 : i32
    %c0_i32_1 = arith.constant 0 : i32
    return %c0_i32, %c0_i32_0 : i32, i32
  }
  func.func @transform_7(%arg0: i32) -> (i32, i32) {
    %c0_i32 = arith.constant 0 : i32
    %c0_i32_0 = arith.constant 0 : i32
    return %arg0, %c0_i32 : i32, i32
  }
}

</mosaic_0001>

<bundles_post_ra>
// kernel: mnist_2nn_forward.1
= control target key start
LH: loop header
LB: loop body
LE: loop exit
PB: predicated region body
PF: predicated region fallthrough
CT: control target
= control target key end

     0   :  { %12 = vsyncpa [#allocation3], 0  ;;  %s1955_s0 = inlined_call_operand.hbm [shape: f32[8,784], index: 0, kind: input, shape index: {}]   ;;  %s1956_s1 = inlined_call_operand.hbm [shape: bf16[784,256], index: 1, kind: input, shape index: {}]   ;;  %s1957_s2 = inlined_call_operand.vmem [shape: f32[1,256], index: 2, kind: input, shape index: {}]   ;;  %s1958_s3 = inlined_call_operand.hbm [shape: bf16[256,256], index: 3, kind: input, shape index: {}]   ;;  %s1959_s4 = inlined_call_operand.vmem [shape: f32[1,256], index: 4, kind: input, shape index: {}]   ;;  %s1960_s5 = inlined_call_operand.hbm [shape: bf16[256,128], index: 5, kind: input, shape index: {}]   ;;  %s1961_s6 = inlined_call_operand.vmem [shape: f32[1,128], index: 6, kind: input, shape index: {}]   ;;  %s1962_s7 = inlined_call_operand.hbm [shape: f32[8,128], index: 7, kind: output, shape index: {}]  }
   0x1   :  { %13 = vsyncpa [#allocation6], 0 }
   0x2   :  { %14 = vsyncpa [#allocation9], 0 }
   0x3   :  { %15 = vsyncpa [#allocation4], 0  ;;  %s1830_s24 = smov [#allocation5]   ;;  %s1712_s28 = scalar_lea.hbm %s1956_s1, 12544 }
   0x4   :  { %s31_s25 = sshll.u32 %s1830_s24, 4  ;;  %p1713_p0 = scmp.ne.s32.totalorder %s1956_s1, %s1712_s28  ;;  %s32_s25 = int_to_ptr.vmem [resolvable:$true] %s31_s25 }
   0x5   :  { %p1716_p1 = scmp.lt.u32.totalorder %s1712_s28, %s1956_s1 }
   0x7   :  { %p1718_p2 = pnand %p1716_p1, %p1713_p0 }
   0x9   :  { %1721 = shalt.err (!%p1718_p2)
}
   0xa   :  { %s1722_s10 = scalar_lea.vmem %s32_s25, 12544  ;;  %p1727_p4 = scmp.lt.s32.totalorder %s32_s25, %s32_s25 }
   0xb   :  { %p1723_p3 = scmp.ne.s32.totalorder %s32_s25, %s1722_s10  ;;  %p1728_p5 = scmp.lt.s32.totalorder %s1722_s10, %s1722_s10 }
   0xd   :  { %p1729_p6 = por %p1728_p5, %p1727_p4 }
   0xf   :  { %p1730_p7 = pnand %p1729_p6, %p1723_p3 }
  0x11   :  { %1733 = shalt.err (!%p1730_p7)
}
  0x12   :  { %s1831_s11 = smov 128   ;;  %s1832_s12 = smov 8  }
  0x13   :  { %37 = dma.hbm_to_vmem [thread:$0]  %s1956_s1, 12544, %s32_s25, [#allocation6], %s1831_s11, %s1831_s11, %s1832_s12  }
  0x14   :  { %s1833_s15 = smov [#allocation2]   ;;  %s1834_s17 = smov [#allocation7]  }
  0x15   :  { %s22_s16 = sshll.u32 %s1833_s15, 4  ;;  %s45_s18 = sshll.u32 %s1834_s17, 4  ;;  %s23_s16 = int_to_ptr.vmem [resolvable:$true] %s22_s16  ;;  %s46_s18 = int_to_ptr.vmem [resolvable:$true] %s45_s18 }
  0x16   :  { %s1734_s21 = scalar_lea.hbm %s1955_s0, 896 }
  0x17   :  { %p1735_p8 = scmp.ne.s32.totalorder %s1955_s0, %s1734_s21  ;;  %p1738_p9 = scmp.lt.u32.totalorder %s1734_s21, %s1955_s0 }
  0x19   :  { %p1740_p10 = pnand %p1738_p9, %p1735_p8 }
  0x1b   :  { %1743 = shalt.err (!%p1740_p10)
}
  0x1c   :  { %s1744_s1 = scalar_lea.vmem %s23_s16, 896  ;;  %p1749_p12 = scmp.lt.s32.totalorder %s23_s16, %s23_s16 }
  0x1d   :  { %p1745_p11 = scmp.ne.s32.totalorder %s23_s16, %s1744_s1  ;;  %p1750_p13 = scmp.lt.s32.totalorder %s1744_s1, %s1744_s1 }
  0x1f   :  { %p1751_p0 = por %p1750_p13, %p1749_p12 }
  0x21   :  { %p1752_p1 = pnand %p1751_p0, %p1745_p11 }
  0x23   :  { %1755 = shalt.err (!%p1752_p1)
}
  0x24   :  { %25 = dma.hbm_to_vmem [thread:$0]  %s1955_s0, 896, %s23_s16, [#allocation3]  }
  0x25   :  { %s1756_s30 = scalar_lea.hbm %s1958_s3, 4096 }
  0x26   :  { %p1757_p2 = scmp.ne.s32.totalorder %s1958_s3, %s1756_s30  ;;  %p1760_p3 = scmp.lt.u32.totalorder %s1756_s30, %s1958_s3 }
  0x28   :  { %p1762_p4 = pnand %p1760_p3, %p1757_p2 }
  0x2a   :  { %1765 = shalt.err (!%p1762_p4)
}
  0x2b   :  { %s1766_s14 = scalar_lea.vmem %s46_s18, 4096  ;;  %p1771_p6 = scmp.lt.s32.totalorder %s46_s18, %s46_s18 }
  0x2c   :  { %p1767_p5 = scmp.ne.s32.totalorder %s46_s18, %s1766_s14  ;;  %p1772_p7 = scmp.lt.s32.totalorder %s1766_s14, %s1766_s14 }
  0x2e   :  { %p1773_p8 = por %p1772_p7, %p1771_p6 }
  0x30   :  { %p1774_p9 = pnand %p1773_p8, %p1767_p5 }
  0x32   :  { %1777 = shalt.err (!%p1774_p9)
}
  0x33   :  { %51 = dma.hbm_to_vmem [thread:$0]  %s1958_s3, 4096, %s46_s18, [#allocation6], %s1831_s11, %s1831_s11, %s1832_s12  }
  0x34   :  { %s1835_s16 = smov [#allocation8]   ;;  %s1778_s21 = scalar_lea.hbm %s1960_s5, 2048 }
  0x35   :  { %s59_s17 = sshll.u32 %s1835_s16, 4  ;;  %p1779_p10 = scmp.ne.s32.totalorder %s1960_s5, %s1778_s21  ;;  %s60_s17 = int_to_ptr.vmem [resolvable:$true] %s59_s17 }
  0x36   :  { %p1782_p11 = scmp.lt.u32.totalorder %s1778_s21, %s1960_s5 }
  0x38   :  { %p1784_p12 = pnand %p1782_p11, %p1779_p10 }
  0x3a   :  { %1787 = shalt.err (!%p1784_p12)
}
  0x3b   :  { %s1788_s1 = scalar_lea.vmem %s60_s17, 2048  ;;  %p1793_p0 = scmp.lt.s32.totalorder %s60_s17, %s60_s17 }
  0x3c   :  { %p1789_p13 = scmp.ne.s32.totalorder %s60_s17, %s1788_s1  ;;  %p1794_p1 = scmp.lt.s32.totalorder %s1788_s1, %s1788_s1 }
  0x3e   :  { %p1795_p2 = por %p1794_p1, %p1793_p0 }
  0x40   :  { %p1796_p3 = pnand %p1795_p2, %p1789_p13 }
  0x42   :  { %1799 = shalt.err (!%p1796_p3)
}
  0x43   :  { %s1836_s3 = smov 64   ;;  %s1837_s11 = smov 4  }
  0x44   :  { %65 = dma.hbm_to_vmem [thread:$0]  %s1960_s5, 2048, %s60_s17, [#allocation9], %s1836_s3, %s1836_s3, %s1837_s11  }
  0x45   :  { %1822 = dma.done.wait [#allocation3], 896  }
  0x46   :  { %1823 = vsyncadd [#allocation3], 4294966400 }
  0x47   :  { %1824 = dma.done.wait [#allocation6], 16640  }
  0x48   :  { %1825 = vsyncadd [#allocation6], 4294950656 }
  0x49   :  { %1826 = dma.done.wait [#allocation9], 2048  }
  0x4a   :  { %1827 = vsyncadd [#allocation9], 4294965248  ;;  %v1501_v0 = vld [vmem:[#allocation5 + $0x104] ss:$8 sps:$4 sm:$0xff]   ;;  %v1503_v1 = vld [vmem:[#allocation5 + $0x100] ss:$8 sps:$4 sm:$0xff]  }
  0x4b   :  { %740 = vmatprep.subr.bf16.mxu0 %v1501_v0  ;;  %v1504_v2 = vld [vmem:[#allocation5 + $0x114] ss:$8 sps:$4 sm:$0xff]   ;;  %v1506_v3 = vld [vmem:[#allocation5 + $0x110] ss:$8 sps:$4 sm:$0xff]   ;;  %v1507_v4 = vld [vmem:[#allocation5 + $0x124] ss:$8 sps:$4 sm:$0xff]  }
  0x4c   :  { %741 = vmatpush1.bf16.msra.mxu0 %v1503_v1  ;;  %v1509_v5 = vld [vmem:[#allocation5 + $0x120] ss:$8 sps:$4 sm:$0xff]   ;;  %v1510_v6 = vld [vmem:[#allocation5 + $0x134] ss:$8 sps:$4 sm:$0xff]   ;;  %v1512_v7 = vld [vmem:[#allocation5 + $0x130] ss:$8 sps:$4 sm:$0xff]  }
  0x4d   :  { %742 = vmatprep.subr.bf16.mxu0 %v1504_v2  ;;  %v1513_v8 = vld [vmem:[#allocation5 + $0x144] ss:$8 sps:$4 sm:$0xff]   ;;  %v1515_v9 = vld [vmem:[#allocation5 + $0x140] ss:$8 sps:$4 sm:$0xff]   ;;  %v1516_v10 = vld [vmem:[#allocation5 + $0x154] ss:$8 sps:$4 sm:$0xff]  }
  0x4e   :  { %v1518_v11 = vld [vmem:[#allocation5 + $0x150] ss:$8 sps:$4 sm:$0xff]   ;;  %v1519_v12 = vld [vmem:[#allocation5 + $0x164] ss:$8 sps:$4 sm:$0xff]   ;;  %v1521_v15 = vld [vmem:[#allocation5 + $0x160] ss:$8 sps:$4 sm:$0xff]  }
  0x4f   :  { %v84_v13 = vld [vmem:[#allocation2 + $0x18] sm:$0xff]  ;;  %v1522_v16 = vld [vmem:[#allocation5 + $0x174] ss:$8 sps:$4 sm:$0xff]   ;;  %v1524_v18 = vld [vmem:[#allocation5 + $0x170] ss:$8 sps:$4 sm:$0xff]   ;;  %vm695_vm0 = vcmask 130048  }
  0x50   :  { %743 = vmatpush1.bf16.msra.mxu0 %v1506_v3  ;;  %v91_v14 = vpack.c.bf16 %v84_v13, %v84_v13  ;;  %v1555_v17 = vld [vmem:[#allocation5 + $0x4] ss:$8 sps:$4 sm:$0xff]   ;;  %v1560_v20 = vld [vmem:[#allocation5] ss:$8 sps:$4 sm:$0xff]   ;;  %v1561_v21 = vld [vmem:[#allocation5 + $0x14] ss:$8 sps:$4 sm:$0xff]  }
  0x51   :  { %744 = vmatprep.subr.bf16.mxu0 %v1507_v4  ;;  %v1525_v19 = vld [vmem:[#allocation5 + $0x184] ss:$8 sps:$4 sm:$0xff]   ;;  %699 = vmatprep.subr.bf16.mxu1 %v1555_v17  ;;  %v1566_v22 = vld [vmem:[#allocation5 + $0x10] ss:$8 sps:$4 sm:$0xff]   ;;  %v1527_v24 = vld [vmem:[#allocation5 + $0x180] ss:$8 sps:$4 sm:$0xff]  }
  0x52   :  { %772 = vmatprep.mubr.bf16.mxu0 %v91_v14  ;;  %700 = vmatpush1.bf16.msra.mxu1 %v1560_v20  ;;  %v1567_v23 = vld [vmem:[#allocation5 + $0x24] ss:$8 sps:$4 sm:$0xff]   ;;  %v1528_v25 = vld [vmem:[#allocation5 + $0x194] ss:$8 sps:$4 sm:$0xff]   ;;  %v1572_v26 = vld [vmem:[#allocation5 + $0x20] ss:$8 sps:$4 sm:$0xff]  }
  0x53   :  { %701 = vmatprep.subr.bf16.mxu1 %v1561_v21  ;;  %v1573_v27 = vld [vmem:[#allocation5 + $0x34] ss:$8 sps:$4 sm:$0xff]   ;;  %v1530_v28 = vld [vmem:[#allocation5 + $0x190] ss:$8 sps:$4 sm:$0xff]   ;;  %v1531_v29 = vld [vmem:[#allocation5 + $0x1a4] ss:$8 sps:$4 sm:$0xff]  }
  0x54   :  { %745 = vmatpush1.bf16.msra.mxu0 %v1509_v5  ;;  %v1578_v30 = vld [vmem:[#allocation5 + $0x30] ss:$8 sps:$4 sm:$0xff]   ;;  %v1579_v31 = vld [vmem:[#allocation5 + $0x44] ss:$8 sps:$4 sm:$0xff]   ;;  %v1533_v32 = vld [vmem:[#allocation5 + $0x1a0] ss:$8 sps:$4 sm:$0xff]  }
  0x55   :  { %746 = vmatprep.subr.bf16.mxu0 %v1510_v6  ;;  %v1534_v33 = vld [vmem:[#allocation5 + $0x1b4] ss:$8 sps:$4 sm:$0xff]   ;;  %v1584_v34 = vld [vmem:[#allocation5 + $0x40] ss:$8 sps:$4 sm:$0xff]   ;;  %v1536_v36 = vld [vmem:[#allocation5 + $0x1b0] ss:$8 sps:$4 sm:$0xff]  }
  0x56   :  { %702 = vmatpush1.bf16.msra.mxu1 %v1566_v22  ;;  %v1585_v35 = vld [vmem:[#allocation5 + $0x54] ss:$8 sps:$4 sm:$0xff]   ;;  %v1537_v37 = vld [vmem:[#allocation5 + $0x1c4] ss:$8 sps:$4 sm:$0xff]   ;;  %v1590_v38 = vld [vmem:[#allocation5 + $0x50] ss:$8 sps:$4 sm:$0xff]  }
  0x57   :  { %703 = vmatprep.subr.bf16.mxu1 %v1567_v23  ;;  %v1591_v39 = vld [vmem:[#allocation5 + $0x64] ss:$8 sps:$4 sm:$0xff]   ;;  %v1539_v40 = vld [vmem:[#allocation5 + $0x1c0] ss:$8 sps:$4 sm:$0xff]   ;;  %v1540_v41 = vld [vmem:[#allocation5 + $0x1d4] ss:$8 sps:$4 sm:$0xff]  }
  0x58   :  { %747 = vmatpush1.bf16.msra.mxu0 %v1512_v7  ;;  %v1596_v42 = vld [vmem:[#allocation5 + $0x60] ss:$8 sps:$4 sm:$0xff]   ;;  %v1597_v43 = vld [vmem:[#allocation5 + $0x74] ss:$8 sps:$4 sm:$0xff]   ;;  %v1542_v44 = vld [vmem:[#allocation5 + $0x1d0] ss:$8 sps:$4 sm:$0xff]  }
  0x59   :  { %748 = vmatprep.subr.bf16.mxu0 %v1513_v8  ;;  %v1543_v45 = vld [vmem:[#allocation5 + $0x1e4] ss:$8 sps:$4 sm:$0xff]   ;;  %v1602_v46 = vld [vmem:[#allocation5 + $0x70] ss:$8 sps:$4 sm:$0xff]   ;;  %v1545_v48 = vld [vmem:[#allocation5 + $0x1e0] ss:$8 sps:$4 sm:$0xff]  }
  0x5a   :  { %704 = vmatpush1.bf16.msra.mxu1 %v1572_v26  ;;  %v1603_v47 = vld [vmem:[#allocation5 + $0x84] ss:$8 sps:$4 sm:$0xff]   ;;  %v1546_v49 = vld [vmem:[#allocation5 + $0x1f4] ss:$8 sps:$4 sm:$0xff]   ;;  %v1608_v50 = vld [vmem:[#allocation5 + $0x80] ss:$8 sps:$4 sm:$0xff]  }
  0x5b   :  { %705 = vmatprep.subr.bf16.mxu1 %v1573_v27  ;;  %v1548_v51 = vld [vmem:[#allocation5 + $0x1f0] ss:$8 sps:$4 sm:$0xff]   ;;  %v1609_v52 = vld [vmem:[#allocation5 + $0x94] ss:$8 sps:$4 sm:$0xff]   ;;  %v1551_v54 = vld [vmem:[#allocation5 + $0x204] ss:$8 sps:$4 sm:$0xff]  }
  0x5c   :  { %749 = vmatpush1.bf16.msra.mxu0 %v1515_v9  ;;  %v83_v53 = vld [vmem:[#allocation2 + $0x10] sm:$0xff]  ;;  %v1615_v56 = vld [vmem:[#allocation5 + $0xa4] ss:$8 sps:$4 sm:$0xff]   ;;  %v86_v58 = vld [vmem:[#allocation2 + $0x28] sm:$0xff] }
  0x5d   :  { %750 = vmatprep.subr.bf16.mxu0 %v1516_v10  ;;  %v1614_v55 = vld [vmem:[#allocation5 + $0x90] ss:$8 sps:$4 sm:$0xff]   ;;  %v90_v57 = vpack.c.bf16 %v83_v53, %v83_v53  ;;  %v1549_v59 = vld [vmem:[#allocation5 + $0x200] ss:$8 sps:$4 sm:$0xff]   ;;  %v93_v60 = vpack.c.bf16 %v86_v58, %v86_v58  ;;  %v1554_v61 = vld [vmem:[#allocation5 + $0x214] ss:$8 sps:$4 sm:$0xff]  }
  0x5e   :  { %706 = vmatpush1.bf16.msra.mxu1 %v1578_v30  ;;  %v1620_v62 = vld [vmem:[#allocation5 + $0xa0] ss:$8 sps:$4 sm:$0xff]   ;;  %v1621_v63 = vld [vmem:[#allocation5 + $0xb4] ss:$8 sps:$4 sm:$0xff]   ;;  %v1552_v1 = vld [vmem:[#allocation5 + $0x210] ss:$8 sps:$4 sm:$0xff]  }
  0x5f   :  { %707 = vmatprep.subr.bf16.mxu1 %v1579_v31  ;;  %v82_v0 = vld [vmem:[#allocation2 + $0x8] sm:$0xff]  ;;  %v1559_v3 = vld [vmem:[#allocation5 + $0x224] ss:$8 sps:$4 sm:$0xff]   ;;  %v1557_v6 = vld [vmem:[#allocation5 + $0x220] ss:$8 sps:$4 sm:$0xff]  }
  0x60   :  { %751 = vmatpush1.bf16.msra.mxu0 %v1518_v11  ;;  %v89_v2 = vpack.c.bf16 %v82_v0, %v82_v0  ;;  %v1626_v4 = vld [vmem:[#allocation5 + $0xb0] ss:$8 sps:$4 sm:$0xff]   ;;  %v1627_v5 = vld [vmem:[#allocation5 + $0xc4] ss:$8 sps:$4 sm:$0xff]   ;;  %v1565_v7 = vld [vmem:[#allocation5 + $0x234] ss:$8 sps:$4 sm:$0xff]  }
  0x61   :  { %752 = vmatprep.subr.bf16.mxu0 %v1519_v12  ;;  %v1632_v8 = vld [vmem:[#allocation5 + $0xc0] ss:$8 sps:$4 sm:$0xff]   ;;  %v1633_v9 = vld [vmem:[#allocation5 + $0xd4] ss:$8 sps:$4 sm:$0xff]   ;;  %v1563_v10 = vld [vmem:[#allocation5 + $0x230] ss:$8 sps:$4 sm:$0xff]  }
  0x62   :  { %708 = vmatpush1.bf16.msra.mxu1 %v1584_v34  ;;  %731 = vmatprep.mubr.bf16.mxu1 %v89_v2  ;;  %v1571_v11 = vld [vmem:[#allocation5 + $0x244] ss:$8 sps:$4 sm:$0xff]   ;;  %v1638_v12 = vld [vmem:[#allocation5 + $0xd0] ss:$8 sps:$4 sm:$0xff]   ;;  %v1569_v14 = vld [vmem:[#allocation5 + $0x240] ss:$8 sps:$4 sm:$0xff]  }
  0x63   :  { %709 = vmatprep.subr.bf16.mxu1 %v1585_v35  ;;  %v1639_v13 = vld [vmem:[#allocation5 + $0xe4] ss:$8 sps:$4 sm:$0xff]   ;;  %v1645_v17 = vld [vmem:[#allocation5 + $0xf4] ss:$8 sps:$4 sm:$0xff]   ;;  %v1647_v20 = vld [vmem:[#allocation5 + $0xf0] ss:$8 sps:$4 sm:$0xff]  }
  0x64   :  { %753 = vmatpush1.bf16.msra.mxu0 %v1521_v15  ;;  %v1577_v15 = vld [vmem:[#allocation5 + $0x254] ss:$8 sps:$4 sm:$0xff]   ;;  %v81_v21 = vld [vmem:[#allocation2] sm:$0xff]  ;;  %v1654_v34 = vld [vmem:[#allocation7 + $0x20] ss:$8 sps:$4 sm:$0xff]  }
  0x65   :  { %754 = vmatprep.subr.bf16.mxu0 %v1522_v16  ;;  %v1644_v16 = vld [vmem:[#allocation5 + $0xe0] ss:$8 sps:$4 sm:$0xff]   ;;  %v1650_v23 = vld [vmem:[#allocation7 + $0x4] ss:$8 sps:$4 sm:$0xff]   ;;  %v88_v26 = vpack.c.bf16 %v81_v21, %v81_v21  ;;  %v1653_v27 = vld [vmem:[#allocation7 + $0x14] ss:$8 sps:$4 sm:$0xff]  }
  0x66   :  { %710 = vmatpush1.bf16.msra.mxu1 %v1590_v38  ;;  %v1581_v22 = vld [vmem:[#allocation5 + $0x260] ss:$8 sps:$4 sm:$0xff]   ;;  %v1656_v31 = vld [vmem:[#allocation7 + $0x24] ss:$8 sps:$4 sm:$0xff]   ;;  %v1659_v35 = vld [vmem:[#allocation7 + $0x34] ss:$8 sps:$4 sm:$0xff]  }
  0x67   :  { %711 = vmatprep.subr.bf16.mxu1 %v1591_v39  ;;  %v1651_v30 = vld [vmem:[#allocation7 + $0x10] ss:$8 sps:$4 sm:$0xff]   ;;  %v1662_v39 = vld [vmem:[#allocation7 + $0x44] ss:$8 sps:$4 sm:$0xff]   ;;  %v1631_v53 = vld [vmem:[#allocation5 + $0x2e4] ss:$8 sps:$4 sm:$0xff]  }
  0x68   :  { %755 = vmatpush1.bf16.msra.mxu0 %v1524_v18  ;;  %v1575_v18 = vld [vmem:[#allocation5 + $0x250] ss:$8 sps:$4 sm:$0xff]   ;;  %v1657_v38 = vld [vmem:[#allocation7 + $0x30] ss:$8 sps:$4 sm:$0xff]  }
  0x69   :  { %756 = vmatprep.subr.bf16.mxu0 %v1525_v19  ;;  %v1583_v19 = vld [vmem:[#allocation5 + $0x264] ss:$8 sps:$4 sm:$0xff]   ;;  %v1672_v58 = vld [vmem:[#allocation7 + $0x80] ss:$8 sps:$4 sm:$0xff]   ;;  %v1641_v2 = vld [vmem:[#allocation5 + $0x300] ss:$8 sps:$4 sm:$0xff]  }
  0x6a   :  { %712 = vmatpush1.bf16.msra.mxu1 %v1596_v42  ;;  %v1660_v42 = vld [vmem:[#allocation7 + $0x40] ss:$8 sps:$4 sm:$0xff]  }
  0x6b   :  { %713 = vmatprep.subr.bf16.mxu1 %v1597_v43  ;;  %v1665_v43 = vld [vmem:[#allocation7 + $0x54] ss:$8 sps:$4 sm:$0xff]  }
  0x6c   :  { %757 = vmatpush1.bf16.msra.mxu0 %v1527_v24  ;;  %v1589_v24 = vld [vmem:[#allocation5 + $0x274] ss:$8 sps:$4 sm:$0xff]  }
  0x6d   :  { %758 = vmatprep.subr.bf16.mxu0 %v1528_v25  ;;  %v1648_v25 = vld [vmem:[#allocation7] ss:$8 sps:$4 sm:$0xff]  }
  0x6e   :  { %714 = vmatpush1.bf16.msra.mxu1 %v1602_v46  ;;  %v1663_v46 = vld [vmem:[#allocation7 + $0x50] ss:$8 sps:$4 sm:$0xff]  }
  0x6f   :  { %715 = vmatprep.subr.bf16.mxu1 %v1603_v47  ;;  %v1668_v47 = vld [vmem:[#allocation7 + $0x64] ss:$8 sps:$4 sm:$0xff]  }
  0x70   :  { %759 = vmatpush1.bf16.msra.mxu0 %v1530_v28  ;;  %v1587_v28 = vld [vmem:[#allocation5 + $0x270] ss:$8 sps:$4 sm:$0xff]  }
  0x71   :  { %760 = vmatprep.subr.bf16.mxu0 %v1531_v29  ;;  %v1595_v29 = vld [vmem:[#allocation5 + $0x284] ss:$8 sps:$4 sm:$0xff]  }
  0x72   :  { %716 = vmatpush1.bf16.msra.mxu1 %v1608_v50  ;;  %v1666_v50 = vld [vmem:[#allocation7 + $0x60] ss:$8 sps:$4 sm:$0xff]  }
  0x73   :  { %717 = vmatprep.subr.bf16.mxu1 %v1609_v52  ;;  %v1623_v52 = vld [vmem:[#allocation5 + $0x2d0] ss:$8 sps:$4 sm:$0xff]  }
  0x74   :  { %761 = vmatpush1.bf16.msra.mxu0 %v1533_v32  ;;  %v1593_v32 = vld [vmem:[#allocation5 + $0x280] ss:$8 sps:$4 sm:$0xff]  }
  0x75   :  { %762 = vmatprep.subr.bf16.mxu0 %v1534_v33  ;;  %v1601_v33 = vld [vmem:[#allocation5 + $0x294] ss:$8 sps:$4 sm:$0xff]  }
  0x76   :  { %718 = vmatpush1.bf16.msra.mxu1 %v1614_v55  ;;  %v1674_v55 = vld [vmem:[#allocation7 + $0x84] ss:$8 sps:$4 sm:$0xff]  }
  0x77   :  { %719 = vmatprep.subr.bf16.mxu1 %v1615_v56  ;;  %v1629_v56 = vld [vmem:[#allocation5 + $0x2e0] ss:$8 sps:$4 sm:$0xff]  }
  0x78   :  { %763 = vmatpush1.bf16.msra.mxu0 %v1536_v36  ;;  %v1599_v36 = vld [vmem:[#allocation5 + $0x290] ss:$8 sps:$4 sm:$0xff]  }
  0x79   :  { %764 = vmatprep.subr.bf16.mxu0 %v1537_v37  ;;  %v1607_v37 = vld [vmem:[#allocation5 + $0x2a4] ss:$8 sps:$4 sm:$0xff]  }
  0x7a   :  { %720 = vmatpush1.bf16.msra.mxu1 %v1620_v62  ;;  %v1643_v62 = vld [vmem:[#allocation5 + $0x304] ss:$8 sps:$4 sm:$0xff]  }
  0x7b   :  { %721 = vmatprep.subr.bf16.mxu1 %v1621_v63  ;;  %v1675_v63 = vld [vmem:[#allocation7 + $0x90] ss:$8 sps:$4 sm:$0xff]  }
  0x7c   :  { %765 = vmatpush1.bf16.msra.mxu0 %v1539_v40  ;;  %v1605_v40 = vld [vmem:[#allocation5 + $0x2a0] ss:$8 sps:$4 sm:$0xff]  }
  0x7d   :  { %766 = vmatprep.subr.bf16.mxu0 %v1540_v41  ;;  %v1613_v41 = vld [vmem:[#allocation5 + $0x2b4] ss:$8 sps:$4 sm:$0xff]  }
  0x7e   :  { %722 = vmatpush1.bf16.msra.mxu1 %v1626_v4  ;;  %v1683_v4 = vld [vmem:[#allocation7 + $0xb4] ss:$8 sps:$4 sm:$0xff]  }
  0x7f   :  { %723 = vmatprep.subr.bf16.mxu1 %v1627_v5  ;;  %v1838_v5 = vmov 0  }
  0x80   :  { %767 = vmatpush1.bf16.msra.mxu0 %v1542_v44  ;;  %v1611_v44 = vld [vmem:[#allocation5 + $0x2b0] ss:$8 sps:$4 sm:$0xff]  }
  0x81   :  { %768 = vmatprep.subr.bf16.mxu0 %v1543_v45  ;;  %v1619_v45 = vld [vmem:[#allocation5 + $0x2c4] ss:$8 sps:$4 sm:$0xff]  }
  0x82   :  { %724 = vmatpush1.bf16.msra.mxu1 %v1632_v8  ;;  %v87_v8 = vld [vmem:[#allocation2 + $0x30] sm:$0xff] }
  0x83   :  { %725 = vmatprep.subr.bf16.mxu1 %v1633_v9  ;;  %v1684_v9 = vld [vmem:[#allocation7 + $0xc0] ss:$8 sps:$4 sm:$0xff]  }
  0x84   :  { %769 = vmatpush1.bf16.msra.mxu0 %v1545_v48  ;;  %v1617_v48 = vld [vmem:[#allocation5 + $0x2c0] ss:$8 sps:$4 sm:$0xff]  }
  0x85   :  { %770 = vmatprep.subr.bf16.mxu0 %v1546_v49  ;;  %v1625_v49 = vld [vmem:[#allocation5 + $0x2d4] ss:$8 sps:$4 sm:$0xff]  }
  0x86   :  { %726 = vmatpush1.bf16.msra.mxu1 %v1638_v12  ;;  %v1689_v12 = vld [vmem:[#allocation7 + $0xd4] ss:$8 sps:$4 sm:$0xff]  }
  0x87   :  { %727 = vmatprep.subr.bf16.mxu1 %v1639_v13  ;;  %v1692_v13 = vld [vmem:[#allocation7 + $0xe4] ss:$8 sps:$4 sm:$0xff]  }
  0x88   :  { %771 = vmatpush1.bf16.msra.mxu0 %v1548_v51  ;;  %v1671_v51 = vld [vmem:[#allocation7 + $0x74] ss:$8 sps:$4 sm:$0xff]  }
  0x89   :  { %781 = vmatprep.subr.bf16.mxu0 %v1551_v54  ;;  %v1669_v54 = vld [vmem:[#allocation7 + $0x70] ss:$8 sps:$4 sm:$0xff]  }
  0x8a   :  { %728 = vmatpush1.bf16.msra.mxu1 %v1644_v16  ;;  %v1693_v16 = vld [vmem:[#allocation7 + $0xf0] ss:$8 sps:$4 sm:$0xff]  }
  0x8b   :  { %773 = vmatmul.mubr.bf16.vlgmr.msra.gmra.mrb[0].mxu0 %v90_v57  ;;  %729 = vmatprep.subr.bf16.mxu1 %v1645_v17  ;;  %v1637_v57 = vld [vmem:[#allocation5 + $0x2f4] ss:$8 sps:$4 sm:$0xff]  }
  0x8c   :  { %782 = vmatpush1.bf16.msra.mxu0 %v1549_v59  ;;  %813 = vmatprep.mubr.bf16.mxu0 %v93_v60  ;;  %v1677_v59 = vld [vmem:[#allocation7 + $0x94] ss:$8 sps:$4 sm:$0xff]   ;;  %v1635_v60 = vld [vmem:[#allocation5 + $0x2f0] ss:$8 sps:$4 sm:$0xff]  }
  0x8d   :  { %783 = vmatprep.subr.bf16.mxu0 %v1554_v61  ;;  %v85_v61 = vld [vmem:[#allocation2 + $0x20] sm:$0xff]  ;;  %v1696_v17 = vld [vmem:[#allocation8 + $0x40] sm:$0xff]  }
  0x8e   :  { %730 = vmatpush1.bf16.msra.mxu1 %v1647_v20  ;;  %v92_v0 = vpack.c.bf16 %v85_v61, %v85_v61 }
  0x8f   :  { %1071 = vmatprep.subr.bf16.mxu1 %v1650_v23 }
  0x90   :  { %784 = vmatpush1.bf16.msra.mxu0 %v1552_v1  ;;  %v1680_v1 = vld [vmem:[#allocation7 + $0xa4] ss:$8 sps:$4 sm:$0xff]  }
  0x91   :  { %785 = vmatprep.subr.bf16.mxu0 %v1559_v3  ;;  %732 = vmatmul.mubr.bf16.vlgmr.msra.gmra.mrb[0].mxu1 %v88_v26  ;;  %v1678_v3 = vld [vmem:[#allocation7 + $0xa0] ss:$8 sps:$4 sm:$0xff]  }
  0x92   :  { %1072 = vmatpush1.bf16.msra.mxu1 %v1648_v25  ;;  %v193_v25 = vld [vmem:[%s1957_s2] sm:$0x3] }
  0x93   :  { %1073 = vmatprep.subr.bf16.mxu1 %v1653_v27 }
  0x94   :  { %786 = vmatpush1.bf16.msra.mxu0 %v1557_v6  ;;  %v1681_v6 = vld [vmem:[#allocation7 + $0xb0] ss:$8 sps:$4 sm:$0xff]  }
  0x95   :  { %787 = vmatprep.subr.bf16.mxu0 %v1565_v7  ;;  %v1686_v7 = vld [vmem:[#allocation7 + $0xc4] ss:$8 sps:$4 sm:$0xff]  }
  0x96   :  { %1074 = vmatpush1.bf16.msra.mxu1 %v1651_v30 }
  0x97   :  { %1075 = vmatprep.subr.bf16.mxu1 %v1656_v31 }
  0x98   :  { %788 = vmatpush1.bf16.msra.mxu0 %v1563_v10  ;;  %v94_v10 = vpack.c.bf16 %v87_v8, %v87_v8 }
  0x99   :  { %789 = vmatprep.subr.bf16.mxu0 %v1571_v11  ;;  %v1687_v11 = vld [vmem:[#allocation7 + $0xd0] ss:$8 sps:$4 sm:$0xff]  }
  0x9a   :  { %1076 = vmatpush1.bf16.msra.mxu1 %v1654_v34 }
  0x9b   :  { %1077 = vmatprep.subr.bf16.mxu1 %v1659_v35 }
  0x9c   :  { %790 = vmatpush1.bf16.msra.mxu0 %v1569_v14  ;;  %v1690_v14 = vld [vmem:[#allocation7 + $0xe0] ss:$8 sps:$4 sm:$0xff]  }
  0x9d   :  { %791 = vmatprep.subr.bf16.mxu0 %v1577_v15  ;;  %v1695_v15 = vld [vmem:[#allocation7 + $0xf4] ss:$8 sps:$4 sm:$0xff]  }
  0x9e   :  { %1078 = vmatpush1.bf16.msra.mxu1 %v1657_v38 }
  0x9f   :  { %1079 = vmatprep.subr.bf16.mxu1 %v1662_v39 }
  0xa0   :  { %792 = vmatpush1.bf16.msra.mxu0 %v1575_v18 }
  0xa1   :  { %793 = vmatprep.subr.bf16.mxu0 %v1583_v19 }
  0xa2   :  { %1080 = vmatpush1.bf16.msra.mxu1 %v1660_v42  ;;  %v1698_v42 = vld [vmem:[#allocation8 + $0x48] sm:$0xff]  }
  0xa3   :  { %1081 = vmatprep.subr.bf16.mxu1 %v1665_v43  ;;  %v1699_v43 = vld [vmem:[#allocation8 + $0x8] sm:$0xff]  }
  0xa4   :  { %794 = vmatpush1.bf16.msra.mxu0 %v1581_v22  ;;  %v195_v22 = vlaneseq }
  0xa5   :  { %795 = vmatprep.subr.bf16.mxu0 %v1589_v24 }
  0xa6   :  { %1082 = vmatpush1.bf16.msra.mxu1 %v1663_v46  ;;  %v196_v23 = vshrl.u32 %v195_v22, 7  ;;  %v1702_v46 = vld [vmem:[#allocation8 + $0x58] sm:$0xff]  }
  0xa7   :  { %1083 = vmatprep.subr.bf16.mxu1 %v1668_v47  ;;  %v1703_v47 = vld [vmem:[#allocation8 + $0x18] sm:$0xff]  }
  0xa8   :  { %796 = vmatpush1.bf16.msra.mxu0 %v1587_v28  ;;  %v197_v24 = vsub.s32 0, %v196_v23  ;;  %v201_v26 = vsub.s32 1, %v196_v23 }
  0xa9   :  { %797 = vmatprep.subr.bf16.mxu0 %v1595_v29 }
  0xaa   :  { %1084 = vmatpush1.bf16.msra.mxu1 %v1666_v50  ;;  %v198_v27 = vrot.slane %v193_v25, %v197_v24  ;;  %v202_v28 = vrot.slane %v193_v25, %v201_v26  ;;  %v1706_v50 = vld [vmem:[#allocation8 + $0x68] sm:$0xff]  }
  0xab   :  { %1085 = vmatprep.subr.bf16.mxu1 %v1671_v51  ;;  %v1707_v51 = vld [vmem:[#allocation8 + $0x28] sm:$0xff]  }
  0xac   :  { %798 = vmatpush1.bf16.msra.mxu0 %v1593_v32 }
  0xad   :  { %799 = vmatprep.subr.bf16.mxu0 %v1601_v33 }
  0xae   :  { %1086 = vmatpush1.bf16.msra.mxu1 %v1669_v54  ;;  %v1710_v54 = vld [vmem:[#allocation8 + $0x78] sm:$0xff]  }
  0xaf   :  { %1087 = vmatprep.subr.bf16.mxu1 %v1674_v55  ;;  %v1711_v55 = vld [vmem:[#allocation8 + $0x38] sm:$0xff]  }
  0xb0   :  { %800 = vmatpush1.bf16.msra.mxu0 %v1599_v36 }
  0xb1   :  { %801 = vmatprep.subr.bf16.mxu0 %v1607_v37 }
  0xb2   :  { %1088 = vmatpush1.bf16.msra.mxu1 %v1672_v58 }
  0xb3   :  { %1089 = vmatprep.subr.bf16.mxu1 %v1677_v59 }
  0xb4   :  { %802 = vmatpush1.bf16.msra.mxu0 %v1605_v40  ;;  %v1697_v40 = vld [vmem:[#allocation8] sm:$0xff]  }
  0xb5   :  { %803 = vmatprep.subr.bf16.mxu0 %v1613_v41 }
  0xb6   :  { %1090 = vmatpush1.bf16.msra.mxu1 %v1675_v63 }
  0xb7   :  { %1091 = vmatprep.subr.bf16.mxu1 %v1680_v1 }
  0xb8   :  { %804 = vmatpush1.bf16.msra.mxu0 %v1611_v44  ;;  %v1700_v44 = vld [vmem:[#allocation8 + $0x50] sm:$0xff]  }
  0xb9   :  { %805 = vmatprep.subr.bf16.mxu0 %v1619_v45  ;;  %v1701_v45 = vld [vmem:[#allocation8 + $0x10] sm:$0xff]  }
  0xba   :  { %1092 = vmatpush1.bf16.msra.mxu1 %v1678_v3 }
  0xbb   :  { %1093 = vmatprep.subr.bf16.mxu1 %v1683_v4 }
  0xbc   :  { %806 = vmatpush1.bf16.msra.mxu0 %v1617_v48  ;;  %v1704_v48 = vld [vmem:[#allocation8 + $0x60] sm:$0xff]  }
  0xbd   :  { %807 = vmatprep.subr.bf16.mxu0 %v1625_v49  ;;  %v1705_v49 = vld [vmem:[#allocation8 + $0x20] sm:$0xff]  }
  0xbe   :  { %1094 = vmatpush1.bf16.msra.mxu1 %v1681_v6  ;;  %v1440_v6 = vld [vmem:[%s1961_s6] ss:$0 sm:$0xff] }
  0xbf   :  { %1095 = vmatprep.subr.bf16.mxu1 %v1686_v7 }
  0xc0   :  { %808 = vmatpush1.bf16.msra.mxu0 %v1623_v52  ;;  %v1708_v52 = vld [vmem:[#allocation8 + $0x70] sm:$0xff]  }
  0xc1   :  { %809 = vmatprep.subr.bf16.mxu0 %v1631_v53  ;;  %v1709_v53 = vld [vmem:[#allocation8 + $0x30] sm:$0xff]  }
  0xc2   :  { %1096 = vmatpush1.bf16.msra.mxu1 %v1684_v9 }
  0xc3   :  { %1097 = vmatprep.subr.bf16.mxu1 %v1689_v12 }
  0xc4   :  { %810 = vmatpush1.bf16.msra.mxu0 %v1629_v56  ;;  %v899_v56 = vld [vmem:[%s1959_s4] sm:$0x3]  ;;  %s1839_s4 = smov [#allocation10]  }
  0xc5   :  { %811 = vmatprep.subr.bf16.mxu0 %v1637_v57  ;;  %v904_v57 = vrot.slane %v899_v56, %v197_v24  ;;  %v908_v58 = vrot.slane %v899_v56, %v201_v26  ;;  %s1298_s30 = sshll.u32 %s1839_s4, 4  ;;  %s1299_s30 = int_to_ptr.vmem [resolvable:$true] %s1298_s30 }
  0xc6   :  { %1098 = vmatpush1.bf16.msra.mxu1 %v1687_v11  ;;  %s1800_s8 = scalar_lea.vmem %s1299_s30, 128  ;;  %p1805_p5 = scmp.lt.s32.totalorder %s1299_s30, %s1299_s30 }
  0xc7   :  { %1099 = vmatprep.subr.bf16.mxu1 %v1692_v13  ;;  %p1801_p4 = scmp.ne.s32.totalorder %s1299_s30, %s1800_s8  ;;  %p1806_p6 = scmp.lt.s32.totalorder %s1800_s8, %s1800_s8 }
  0xc8   :  { %812 = vmatpush1.bf16.msra.mxu0 %v1635_v60 }
  0xc9   :  { %822 = vmatprep.subr.bf16.mxu0 %v1643_v62  ;;  %p1807_p7 = por %p1806_p6, %p1805_p5 }
  0xca   :  { %1100 = vmatpush1.bf16.msra.mxu1 %v1690_v14 }
  0xcb   :  { %814 = vmatmul.mubr.bf16.vlgmr.msra.gmra.mrb[0].mxu0 %v92_v0  ;;  %1101 = vmatprep.subr.bf16.mxu1 %v1695_v15  ;;  %p1808_p8 = pnand %p1807_p7, %p1801_p4 }
  0xcc   :  { %823 = vmatpush1.bf16.msra.mxu0 %v1641_v2  ;;  %854 = vmatprep.mubr.bf16.mxu0 %v1838_v5 }
  0xce   :  { %1102 = vmatpush1.bf16.msra.mxu1 %v1693_v16 }
  0xcf   :  { %1457 = vmatprep.subr.bf16.mxu1 %v1696_v17 }
  0xd7   :  { %1407 = vmatmul.mubr.msk.bf16.vlgmr.msra.gmra.mrb[0].mxu0 %vm695_vm0, %v94_v10 }
 0x164   :  { %v733_v18 = vpop.f32.mrb[0].mxu1 }
 0x165   :  { %v735_v19 = vpop.f32.mrb[1].mxu1  ;;  %v734_v29 = vadd.f32 %v733_v18, %v198_v27 }
 0x166   :  { %v737_v20 = vpop.f32.mrb[2].mxu1  ;;  %v736_v30 = vadd.f32 %v735_v19, %v202_v28 }
 0x167   :  { %v738_v21 = vpop.f32.mrb[3].mxu1 }
 0x1aa   :  { %v856_v31 = vpop.f32.mrb[0].mxu0 }
 0x1ab   :  { %v1480_v32 = vadd.f32 %v856_v31, %v734_v29  ;;  %v858_v33 = vpop.f32.mrb[1].mxu0 }
 0x1ac   :  { %v1482_v34 = vadd.f32 %v858_v33, %v736_v30  ;;  %v860_v35 = vpop.f32.mrb[2].mxu0 }
 0x1ad   :  { %v863_v36 = vmax.f32 %v1480_v32, 0.0  ;;  %v861_v37 = vpop.f32.mrb[3].mxu0 }
 0x1ae   :  { %v864_v38 = vmax.f32 %v1482_v34, 0.0 }
 0x1af   :  { %v865_v41 = vpack.c.bf16 %v863_v36, %v863_v36 }
 0x1b0   :  { %v866_v39 = vpack.c.bf16 %v864_v38, %v864_v38 }
 0x1b2   :  { %1103 = vmatprep.mubr.bf16.mxu1 %v866_v39 }
 0x1b3   :  { %1104 = vmatmul.mubr.bf16.vlgmr.msra.gmra.mrb[4].mxu1 %v865_v41 }
 0x1b4   :  { %1458 = vmatpush3.bf16.msra.mxu1 %v1697_v40 }
 0x1b5   :  { %1459 = vmatprep.subr.bf16.mxu1 %v1698_v42 }
 0x1b8   :  { %1460 = vmatpush3.bf16.msra.mxu1 %v1699_v43 }
 0x1b9   :  { %1461 = vmatprep.subr.bf16.mxu1 %v1700_v44 }
 0x1bc   :  { %1462 = vmatpush3.bf16.msra.mxu1 %v1701_v45 }
 0x1bd   :  { %1463 = vmatprep.subr.bf16.mxu1 %v1702_v46 }
 0x1c0   :  { %1464 = vmatpush3.bf16.msra.mxu1 %v1703_v47 }
 0x1c1   :  { %1465 = vmatprep.subr.bf16.mxu1 %v1704_v48 }
 0x1c4   :  { %1466 = vmatpush3.bf16.msra.mxu1 %v1705_v49 }
 0x1c5   :  { %1467 = vmatprep.subr.bf16.mxu1 %v1706_v50 }
 0x1c8   :  { %1468 = vmatpush3.bf16.msra.mxu1 %v1707_v51 }
 0x1c9   :  { %1469 = vmatprep.subr.bf16.mxu1 %v1708_v52 }
 0x1cc   :  { %1470 = vmatpush3.bf16.msra.mxu1 %v1709_v53 }
 0x1cd   :  { %1471 = vmatprep.subr.bf16.mxu1 %v1710_v54 }
 0x1d0   :  { %1472 = vmatpush3.bf16.msra.mxu1 %v1711_v55 }
 0x286   :  { %v1105_v59 = vpop.f32.mrb[4].mxu1 }
 0x287   :  { %v1106_v60 = vadd.f32 %v1105_v59, %v904_v57  ;;  %v1107_v61 = vpop.f32.mrb[5].mxu1 }
 0x288   :  { %v1108_v62 = vadd.f32 %v1107_v61, %v908_v58  ;;  %v1109_v63 = vpop.f32.mrb[6].mxu1 }
 0x289   :  { %v1112_v0 = vmax.f32 %v1106_v60, 0.0  ;;  %v1110_v1 = vpop.f32.mrb[7].mxu1 }
 0x28a   :  { %v1113_v2 = vmax.f32 %v1108_v62, 0.0 }
 0x28b   :  { %v1114_v4 = vpack.c.bf16 %v1112_v0, %v1112_v0 }
 0x28c   :  { %v1115_v3 = vpack.c.bf16 %v1113_v2, %v1113_v2 }
 0x28e   :  { %1283 = vmatprep.mubr.bf16.mxu1 %v1115_v3 }
 0x28f   :  { %1284 = vmatmul.mubr.bf16.vlgmr.msra.gmra.mrb[8].mxu1 %v1114_v4 }
 0x362   :  { %v1473_v5 = vpop.f32.mrb[8].mxu1 }
 0x363   :  { %v1474_v7 = vpop.f32.mrb[9].mxu1 }
 0x364   :  { %v1475_v8 = vadd.f32 %v1474_v7, %v1473_v5  ;;  %v1476_v9 = vpop.f32.mrb[10].mxu1 }
 0x365   :  { %v1477_v10 = vpop.f32.mrb[11].mxu1 }
 0x366   :  { %v1286_v11 = vadd.f32 %v1475_v8, %v1440_v6 }
 0x368   :  { %1291 = vst [vmem:[#allocation10] sm:$0xff] %v1286_v11 }
 0x369   :  { %1811 = shalt.err (!%p1808_p8)
}
 0x36a   :  { %s1812_s6 = scalar_lea.hbm %s1962_s7, 128 }
 0x36b   :  { %p1813_p9 = scmp.ne.s32.totalorder %s1962_s7, %s1812_s6  ;;  %p1816_p10 = scmp.lt.u32.totalorder %s1812_s6, %s1962_s7 }
 0x36d   :  { %p1818_p11 = pnand %p1816_p10, %p1813_p9 }
 0x36f   :  { %1821 = shalt.err (!%p1818_p11)
}
 0x370   :  { %1301 = dma.vmem_to_hbm [thread:$0]  %s1299_s30, 128, %s1962_s7, [#allocation4]  }
 0x371   :  { %1828 = dma.done.wait [#allocation4], 128  }
 0x372   :  { %1829 = vsyncadd [#allocation4], 4294967168 }
 0x373   :  { %1305 = vsyncpa [#allocation3], 1 }
 0x374   :  { %1306 = vsyncpa [#allocation6], 1 }
 0x375   :  { %1307 = vsyncpa [#allocation9], 1 }
 0x376   :  { %1308 = vsyncpa [#allocation4], 1 }

</bundles_post_ra>
